<compile_context>
chip_gen: v7x
topology: tpu7x:2x2x1
jax: 0.10.0
libtpu: 0.0.40
codegen_flags: <defaults>
</compile_context>

<pallas_src>
import functools

import numpy as np
import jax
import jax.numpy as jnp
from jax.experimental import pallas as pl
from jax.experimental.pallas import tpu as pltpu


LANE = 128
MAX_TILE = 1024  # (K=32, 1024) f32 out block = 128 KiB; x2 buffers fits easily in
                 # VMEM on v5e/v6e (128 MiB) and v7x (64 MiB).


# ------------------------------ Pallas kernels ------------------------------

def _cutoff_factor(r, rc):
    # Faithful to the reference cosine_cutoff (incl. its cos(r/r) == cos(1) quirk
    # for r < rc), but with the denominator clamped under the mask so no inf/NaN
    # lanes are ever generated (they would just be selected away anyway).
    mask = r < rc
    rcm = jnp.where(mask, r, jnp.ones_like(r))
    return jnp.where(mask, jnp.cos(r / rcm), jnp.zeros_like(r))


def _bessel_kernel(r_ref, alpha_scaled_ref, coeff_ref, out_ref, *, rc, use_cutoff):
    # r:            (1, TN)  distances on the lane axis (lane-dense load)
    # alpha_scaled: (K, 1)   == alpha * pi / rc      (folded host-side)
    # coeff:        (K, 1)   == prefactor / beta     (folded host-side)
    r = r_ref[...]
    inv_r = 1.0 / r                                   # one divide per distance
    rbf = coeff_ref[...] * jnp.sin(alpha_scaled_ref[...] * r) * inv_r   # (K, TN)
    if use_cutoff:
        rbf = rbf * _cutoff_factor(r, rc)
    out_ref[...] = rbf


def _gaussian_kernel(r_ref, center_ref, out_ref, *, width, alpha_sp, rc,
                     use_cutoff, exp_weighting):
    # r:      (1, TN)
    # center: (K, 1)
    # alpha_sp (= softplus(_alpha)) and width are trace-time constants baked in.
    r = r_ref[...]
    expalphar = jnp.exp(-alpha_sp * r)                # one exp per distance
    diff = expalphar - center_ref[...]                # (K, TN)
    rbf = jnp.exp(-width * diff * diff)
    if use_cutoff:
        rbf = _cutoff_factor(r, rc) * rbf
    if exp_weighting:
        rbf = rbf * expalphar
    out_ref[...] = rbf


# ------------------------------ JAX-side module ------------------------------

def _softplus_inverse(x):
    return x + np.log(-np.expm1(-x))


class RadialBasis:
    """JAX/Pallas port of Radial_Basis (bessel / trainable_bessel / gaussian / exp_gaussian)."""

    def __init__(self, radial_type='bessel', num_radial=32, rc=5.0, use_cutoff=False):
        assert rc != 0
        self.radial_type = radial_type
        self.num_radial = int(num_radial)
        self.rc = float(rc)
        self.use_cutoff = bool(use_cutoff)

        k = self.num_radial
        if radial_type in ('bessel', 'trainable_bessel'):
            if radial_type == 'trainable_bessel':
                alpha = np.arange(0, k, dtype=np.float32)
                beta = np.full((k,), 2.0, dtype=np.float32)
            else:
                alpha = np.arange(1, k + 1, dtype=np.float32)
                beta = np.ones((k,), dtype=np.float32)
            prefactor = (2.0 / self.rc) ** 0.5
            # host-side constant folding: coeff * sin(alpha_scaled * r) / r
            self.alpha_scaled = jnp.asarray(
                (alpha * np.pi / self.rc).reshape(k, 1).astype(np.float32))
            self.coeff = jnp.asarray(
                (prefactor / beta).reshape(k, 1).astype(np.float32))
        elif radial_type in ('gaussian', 'exp_gaussian'):
            self.center = jnp.asarray(
                np.linspace(1.0, 0.0, k, dtype=np.float32).reshape(k, 1))
            self.width = float(k)
            alpha_raw = _softplus_inverse(0.95)                  # nn.init.constant_(_alpha, ...)
            self.alpha_sp = float(np.log1p(np.exp(alpha_raw)))   # F.softplus(_alpha), trace-time constant
            self.exp_weighting = (radial_type == 'exp_gaussian')
        else:
            raise ValueError(radial_type)

    def __call__(self, r):
        # Distances on the lane axis -> lane-dense loads and (K, N) lane-dense stores.
        r_row = jnp.reshape(r, (1, -1)).astype(jnp.float32)
        n = r_row.shape[1]
        k = self.num_radial

        # Big lane tile (amortizes per-grid-step overhead), multiple of 128,
        # but no bigger than the padded problem itself.
        tn = min(MAX_TILE, ((n + LANE - 1) // LANE) * LANE)
        n_pad = ((n + tn - 1) // tn) * tn
        if n_pad != n:
            # pad with 1.0 so padded lanes never divide by zero; sliced off below
            r_row = jnp.pad(r_row, ((0, 0), (0, n_pad - n)), constant_values=1.0)

        grid = (n_pad // tn,)
        r_spec = pl.BlockSpec((1, tn), lambda i: (0, i))
        col_spec = pl.BlockSpec((k, 1), lambda i: (0, 0))
        out_spec = pl.BlockSpec((k, tn), lambda i: (0, i))
        out_shape = jax.ShapeDtypeStruct((k, n_pad), jnp.float32)
        cparams = pltpu.CompilerParams(dimension_semantics=("parallel",))
        cost = pl.CostEstimate(
            flops=6 * n_pad * k,
            transcendentals=n_pad * (k + 2),
            bytes_accessed=4 * (n_pad + 2 * k + n_pad * k),
        )

        if self.radial_type in ('bessel', 'trainable_bessel'):
            kernel = functools.partial(
                _bessel_kernel, rc=self.rc, use_cutoff=self.use_cutoff)
            out_t = pl.pallas_call(
                kernel, out_shape=out_shape, grid=grid,
                in_specs=[r_spec, col_spec, col_spec],
                out_specs=out_spec,
                compiler_params=cparams, cost_estimate=cost,
            )(r_row, self.alpha_scaled, self.coeff)
        else:
            kernel = functools.partial(
                _gaussian_kernel, width=self.width, alpha_sp=self.alpha_sp,
                rc=self.rc, use_cutoff=self.use_cutoff,
                exp_weighting=self.exp_weighting)
            out_t = pl.pallas_call(
                kernel, out_shape=out_shape, grid=grid,
                in_specs=[r_spec, col_spec],
                out_specs=out_spec,
                compiler_params=cparams, cost_estimate=cost,
            )(r_row, self.center)

        # kernel produces lane-dense (K, N_pad); module contract is (N, K)
        return out_t[:, :n].T


# --------------------------------- references ---------------------------------

def _ref_cutoff(r, rc):
    mask = r < rc
    rcm = jnp.where(mask, r, jnp.ones_like(r))
    return jnp.where(mask, jnp.cos(r / rcm), jnp.zeros_like(r))


def _ref_bessel(r, num_radial, rc, weighting, use_cutoff):
    r = jnp.reshape(r, (-1, 1)).astype(jnp.float32)
    if weighting:
        alpha = jnp.arange(0, num_radial, dtype=jnp.float32).reshape(1, -1)
        beta = jnp.full((1, num_radial), 2.0, dtype=jnp.float32)
    else:
        alpha = jnp.arange(1, num_radial + 1, dtype=jnp.float32).reshape(1, -1)
        beta = 1.0
    prefactor = (2.0 / rc) ** 0.5
    rbf = prefactor * jnp.sin(alpha * jnp.pi * r / rc) / (beta * r)
    if use_cutoff:
        rbf = rbf * _ref_cutoff(r, rc)
    return rbf


def _ref_gaussian(r, num_radial, alpha_sp, exp_weighting, rc, use_cutoff):
    r = jnp.reshape(r, (-1, 1)).astype(jnp.float32)
    center = jnp.asarray(np.linspace(1.0, 0.0, num_radial, dtype=np.float32)).reshape(1, -1)
    width = float(num_radial)
    expalphar = jnp.exp(-alpha_sp * r)
    rbf = jnp.exp(-width * (expalphar - center) ** 2)
    if use_cutoff:
        rbf = _ref_cutoff(r, rc) * rbf
    if exp_weighting:
        rbf = rbf * expalphar
    return rbf


# ------------------------------------ main ------------------------------------

if __name__ == "__main__":
    num_radial = 32
    rc = 5.0

    # small, module-consistent input: 60 interatomic distances
    r_small = jax.random.uniform(jax.random.PRNGKey(0), (60,), dtype=jnp.float32,
                                 minval=0.1, maxval=6.0)
    # larger input to exercise a multi-step lane-tiled grid (tn=1024, grid=(3,))
    r_big = jax.random.uniform(jax.random.PRNGKey(1), (3000,), dtype=jnp.float32,
                               minval=0.1, maxval=6.0)

    # default configuration of Radial_Basis: bessel, no cutoff
    rb = RadialBasis('bessel', num_radial=num_radial, rc=rc, use_cutoff=False)
    out = rb(r_small)
    jax.block_until_ready(out)
    assert out.shape == (60, num_radial)
    np.testing.assert_allclose(
        np.asarray(out), np.asarray(_ref_bessel(r_small, num_radial, rc, False, False)),
        rtol=1e-4, atol=5e-5)

    out_big = rb(r_big)
    jax.block_until_ready(out_big)
    np.testing.assert_allclose(
        np.asarray(out_big), np.asarray(_ref_bessel(r_big, num_radial, rc, False, False)),
        rtol=1e-4, atol=5e-5)

    # bessel + cosine-cutoff branch
    rb_c = RadialBasis('bessel', num_radial=num_radial, rc=rc, use_cutoff=True)
    out_c = rb_c(r_small)
    jax.block_until_ready(out_c)
    np.testing.assert_allclose(
        np.asarray(out_c), np.asarray(_ref_bessel(r_small, num_radial, rc, False, True)),
        rtol=1e-4, atol=5e-5)

    # exp_gaussian variant
    rb_g = RadialBasis('exp_gaussian', num_radial=num_radial, rc=rc, use_cutoff=False)
    out_g = rb_g(r_small)
    jax.block_until_ready(out_g)
    np.testing.assert_allclose(
        np.asarray(out_g),
        np.asarray(_ref_gaussian(r_small, num_radial, rb_g.alpha_sp, True, rc, False)),
        rtol=1e-4, atol=5e-5)

    print("KERNEL_OK")
</pallas_src>

<mosaic_0001>
module attributes {stable_mosaic.version = 11 : i64} {
  func.func @_bessel_kernel(%arg0: i32, %arg1: memref<1x128xf32, #tpu.memory_space<vmem>>, %arg2: memref<32x1xf32, #tpu.memory_space<vmem>>, %arg3: memref<32x1xf32, #tpu.memory_space<vmem>>, %arg4: memref<32x128xf32, #tpu.memory_space<vmem>>) attributes {dimension_semantics = [#tpu.dimension_semantics<parallel>], iteration_bounds = array<i64: 1>, scalar_prefetch = 0 : i64, scratch_operands = 0 : i64, tpu.core_type = #tpu.core_type<tc>, window_params = [{transform_indices = @transform_0, window_bounds = array<i64: 1, 128>}, {pipeline_mode = #tpu.pipeline_mode<synchronous>, transform_indices = @transform_1, window_bounds = array<i64: 32, 1>}, {pipeline_mode = #tpu.pipeline_mode<synchronous>, transform_indices = @transform_2, window_bounds = array<i64: 32, 1>}, {transform_indices = @transform_3, window_bounds = array<i64: 32, 128>}]} {
    %c0 = arith.constant 0 : index
    %c0_0 = arith.constant 0 : index
    %0 = vector.load %arg1[%c0, %c0_0] : memref<1x128xf32, #tpu.memory_space<vmem>>, vector<1x128xf32>
    %cst = arith.constant 1.000000e+00 : f32
    %1 = vector.broadcast %cst : f32 to vector<1x128xf32>
    %2 = arith.divf %1, %0 : vector<1x128xf32>
    %c0_1 = arith.constant 0 : index
    %c0_2 = arith.constant 0 : index
    %3 = vector.load %arg3[%c0_1, %c0_2] : memref<32x1xf32, #tpu.memory_space<vmem>>, vector<32x1xf32>
    %c0_3 = arith.constant 0 : index
    %c0_4 = arith.constant 0 : index
    %4 = vector.load %arg2[%c0_3, %c0_4] : memref<32x1xf32, #tpu.memory_space<vmem>>, vector<32x1xf32>
    %5 = vector.broadcast %4 : vector<32x1xf32> to vector<32x128xf32>
    %6 = vector.broadcast %0 : vector<1x128xf32> to vector<32x128xf32>
    %7 = arith.mulf %5, %6 : vector<32x128xf32>
    %8 = math.sin %7 : vector<32x128xf32>
    %9 = vector.broadcast %3 : vector<32x1xf32> to vector<32x128xf32>
    %10 = arith.mulf %9, %8 : vector<32x128xf32>
    %11 = vector.broadcast %2 : vector<1x128xf32> to vector<32x128xf32>
    %12 = arith.mulf %10, %11 : vector<32x128xf32>
    %c0_5 = arith.constant 0 : index
    %c0_6 = arith.constant 0 : index
    %13 = vector.load %arg4[%c0_5, %c0_6] : memref<32x128xf32, #tpu.memory_space<vmem>>, vector<32x128xf32>
    tpu.vector_store %arg4[%c0_5, %c0_6], %12 {strides = array<i32>} : memref<32x128xf32, #tpu.memory_space<vmem>>, vector<32x128xf32>,
    return
  }
  func.func @transform_0(%arg0: i32) -> (i32, i32) {
    %c0_i32 = arith.constant 0 : i32
    %c0_i32_0 = arith.constant 0 : i32
    return %c0_i32, %arg0 : i32, i32
  }
  func.func @transform_1(%arg0: i32) -> (i32, i32) {
    %c0_i32 = arith.constant 0 : i32
    %c0_i32_0 = arith.constant 0 : i32
    %c0_i32_1 = arith.constant 0 : i32
    return %c0_i32, %c0_i32_0 : i32, i32
  }
  func.func @transform_2(%arg0: i32) -> (i32, i32) {
    %c0_i32 = arith.constant 0 : i32
    %c0_i32_0 = arith.constant 0 : i32
    %c0_i32_1 = arith.constant 0 : i32
    return %c0_i32, %c0_i32_0 : i32, i32
  }
  func.func @transform_3(%arg0: i32) -> (i32, i32) {
    %c0_i32 = arith.constant 0 : i32
    %c0_i32_0 = arith.constant 0 : i32
    return %c0_i32, %arg0 : i32, i32
  }
}

</mosaic_0001>

<bundles_post_ra>
// kernel: tpu_custom_call.1
= control target key start
LH: loop header
LB: loop body
LE: loop exit
PB: predicated region body
PF: predicated region fallthrough
CT: control target
= control target key end

     0   :  { %v612_v2 = vmov 0   ;;  %s1063_s0 = inlined_call_operand.vmem [shape: f32[1,128], index: 0, kind: input, shape index: {}]   ;;  %s1064_s1 = inlined_call_operand.vmem [shape: f32[32,1], index: 1, kind: input, shape index: {}]   ;;  %s1065_s2 = inlined_call_operand.vmem [shape: f32[32,1], index: 2, kind: input, shape index: {}]   ;;  %s1066_s3 = inlined_call_operand.hbm [shape: f32[32,128], index: 3, kind: output, shape index: {}]  }
   0x1   :  { %v24_v0 = vld [vmem:[%s1064_s1 + $0x10] sm:$0xff]  ;;  %v22_v1 = vld [vmem:[%s1064_s1] sm:$0xff]  ;;  %569 = vset.pattern.permute.xlu1 %v612_v2  ;;  %568 = vset.pattern.permute.xlu0 %v612_v2  ;;  %v25_v3 = vld [vmem:[%s1064_s1 + $0x18] sm:$0xff] }
   0x2   :  { %38 = vperm.xlu1 %569, %v24_v0   ;;  %28 = vperm.xlu0 %568, %v22_v1   ;;  %v23_v4 = vld [vmem:[%s1064_s1 + $0x8] sm:$0xff] }
   0x3   :  { %8 = vsyncpa [#allocation3], 0  ;;  %v19_v5 = vld [vmem:[%s1065_s2 + $0x8] sm:$0xff]  ;;  %v18_v6 = vld [vmem:[%s1065_s2] sm:$0xff]  ;;  %v47_v9 = vlaneseq  ;;  %v613_v50 = vmov 2102212464  }
   0x4   :  { %v21_v7 = vld [vmem:[%s1065_s2 + $0x18] sm:$0xff]  ;;  %v20_v8 = vld [vmem:[%s1065_s2 + $0x10] sm:$0xff]  ;;  %v672_v12 = vld [vmem:[%s1063_s0] sm:$0x1]  ;;  %v614_v52 = vmov 920167782  }
   0x5   :  { %v666_v10 = vshrl.u32 %v47_v9, 7  ;;  %v615_v56 = vmov 1326507024   ;;  %s619_s0 = smov [#allocation2]  }
   0x6   :  { %43 = vperm.xlu1 %569, %v25_v3   ;;  %33 = vperm.xlu0 %568, %v23_v4   ;;  %s515_s2 = sshll.u32 %s619_s0, 4  ;;  %s516_s2 = int_to_ptr.vmem [resolvable:$true] %s515_s2 }
   0x7   :  { %v49_v11 = vsub.s32 0, %v666_v10  ;;  %s588_s29 = scalar_lea.vmem %s516_s2, 512  ;;  %p593_p1 = scmp.lt.s32.totalorder %s516_s2, %s516_s2 }
   0x8   :  { %p589_p0 = scmp.ne.s32.totalorder %s516_s2, %s588_s29  ;;  %p594_p2 = scmp.lt.s32.totalorder %s588_s29, %s588_s29 }
   0x9   :  { %v50_v13 = vrot.slane %v672_v12, %v49_v11 }
   0xa   :  { %479 = vperm.xlu1 %569, %v19_v5   ;;  %474 = vperm.xlu0 %568, %v18_v6   ;;  %p595_p3 = por %p594_p2, %p593_p1 }
   0xc   :  { %p596_p4 = pnand %p595_p3, %p589_p0 }
   0xe   :  { %489 = vperm.xlu1 %569, %v21_v7   ;;  %484 = vperm.xlu0 %568, %v20_v8  }
  0x81   :  { %v39_v14 = vpop.permute.xlu1 %38  ;;  %v29_v15 = vpop.permute.xlu0 %28 }
  0x82   :  { %v677_v16 = vmul.f32 %v50_v13, %v39_v14  ;;  %v679_v17 = vmul.f32 %v50_v13, %v29_v15 }
  0x84   :  { %v267_v18 = vand.u32 2139095040, %v677_v16  ;;  %v59_v19 = vand.u32 2139095040, %v679_v17  ;;  %v56_v31 = vand.u32 2147483647, %v679_v17 }
  0x85   :  { %v44_v20 = vpop.permute.xlu1 %43  ;;  %v34_v21 = vpop.permute.xlu0 %33 }
  0x86   :  { %v268_v22 = vshrl.u32 %v267_v18, 23  ;;  %v60_v23 = vshrl.u32 %v59_v19, 23  ;;  %v683_v24 = vmul.f32 %v50_v13, %v44_v20  ;;  %v685_v25 = vmul.f32 %v50_v13, %v34_v21 }
  0x87   :  { %v63_v40 = vand.u32 8388607, %v56_v31  ;;  %v616_v21 = vmov 683565275  }
  0x88   :  { %v534_v26 = vadd.s32 4294967169, %v268_v22  ;;  %v526_v27 = vadd.s32 4294967169, %v60_v23  ;;  %v371_v28 = vand.u32 2139095040, %v683_v24  ;;  %v163_v29 = vand.u32 2139095040, %v685_v25 }
  0x89   :  { %v160_v30 = vand.u32 2147483647, %v685_v25  ;;  %v64_v47 = vor.u32 8388608, %v63_v40  ;;  %v368_v3 = vand.u32 2147483647, %v683_v24 }
  0x8a   :  { %v274_v32 = vadd.s32 1, %v534_v26  ;;  %v66_v33 = vadd.s32 1, %v526_v27  ;;  %v372_v34 = vshrl.u32 %v371_v28, 23  ;;  %v164_v35 = vshrl.u32 %v163_v29, 23 }
  0x8b   :  { %v167_v39 = vand.u32 8388607, %v160_v30  ;;  %v726_v0 = vshll.u32 %v64_v47, 8  ;;  %v617_v23 = vmov 2475754826  }
  0x8c   :  { %vm275_vm0 = vcmp.gt.s32.totalorder %v274_v32, 0  ;;  %vm67_vm1 = vcmp.gt.s32.totalorder %v66_v33, 0  ;;  %v538_v36 = vadd.s32 4294967169, %v372_v34  ;;  %v530_v38 = vadd.s32 4294967169, %v164_v35 }
  0x8d   :  { %v68_v37 = vsel %vm67_vm1, %v66_v33, 0  ;;  %v697_v42 = vsel %vm275_vm0, %v274_v32, 0  ;;  %v168_v46 = vor.u32 8388608, %v167_v39  ;;  %v618_v28 = vmov 2131351028  }
  0x8e   :  { %v695_v41 = vand.u32 31, %v68_v37  ;;  %v378_v43 = vadd.s32 1, %v538_v36  ;;  %v170_v44 = vadd.s32 1, %v530_v38  ;;  %v703_v48 = vand.u32 31, %v697_v42 }
  0x8f   :  { %v705_v49 = vshrl.u32 %v68_v37, 5  ;;  %v724_v63 = vshll.u32 %v168_v46, 8 }
  0x90   :  { %v700_v45 = vsub.s32 32, %v695_v41  ;;  %vm379_vm2 = vcmp.gt.s32.totalorder %v378_v43, 0  ;;  %vm171_vm3 = vcmp.gt.s32.totalorder %v170_v44, 0  ;;  %v82_v51 = vshll.u32 %v613_v50, %v695_v41 }
  0x91   :  { %v380_v54 = vsel %vm379_vm2, %v378_v43, 0  ;;  %v172_v55 = vsel %vm171_vm3, %v170_v44, 0  ;;  %v85_v61 = vshll.u32 %v614_v52, %v695_v41  ;;  %v729_v1 = vsub.s32 32, %v703_v48 }
  0x92   :  { %v83_v53 = vshrl.u32 %v614_v52, %v700_v45  ;;  %v713_v57 = vshrl.u32 %v615_v56, %v700_v45  ;;  %v715_v58 = vand.u32 31, %v380_v54  ;;  %v174_v60 = vand.u32 31, %v172_v55 }
  0x93   :  { %vm91_vm4 = vcmp.lt.s32.totalorder %v705_v49, 4  ;;  %v732_v2 = vshrl.u32 %v380_v54, 5  ;;  %v173_v6 = vshrl.u32 %v172_v55, 5  ;;  %v76_v54 = vshll.u32 %v617_v23, %v695_v41 }
  0x94   :  { %v717_v59 = vor.u32 %v83_v53, %v82_v51  ;;  %v722_v62 = vsub.s32 32, %v715_v58  ;;  %v87_v4 = vor.u32 %v713_v57, %v85_v61  ;;  %v394_v5 = vshll.u32 %v613_v50, %v715_v58 }
  0x95   :  { %v175_v7 = vsub.s32 32, %v174_v60  ;;  %v747_v13 = vshll.u32 %v614_v52, %v715_v58  ;;  %v186_v15 = vshll.u32 %v613_v50, %v174_v60  ;;  %v189_v19 = vshll.u32 %v614_v52, %v174_v60 }
  0x96   :  { %v741_v8 = vsel %vm91_vm4, %v717_v59, 920167782  ;;  %v395_v9 = vshrl.u32 %v614_v52, %v722_v62  ;;  %v751_v14 = vshrl.u32 %v615_v56, %v722_v62  ;;  %v177_v22 = vshll.u32 %v616_v21, %v174_v60 }
  0x97   :  { %v187_v18 = vshrl.u32 %v614_v52, %v175_v7  ;;  %v190_v20 = vshrl.u32 %v615_v56, %v175_v7  ;;  %v178_v26 = vshrl.u32 %v617_v23, %v175_v7  ;;  %v180_v27 = vshll.u32 %v617_v23, %v174_v60 }
  0x98   :  { %v181_v29 = vshrl.u32 %v618_v28, %v175_v7  ;;  %vm195_vm5 = vcmp.lt.s32.totalorder %v173_v6, 4  ;;  %v176_v34 = vshrl.u32 %v616_v21, %v175_v7  ;;  %v183_v37 = vshll.u32 %v618_v28, %v174_v60 }
  0x99   :  { %v188_v32 = vor.u32 %v187_v18, %v186_v15  ;;  %v191_v33 = vor.u32 %v190_v20, %v189_v19  ;;  %v179_v35 = vor.u32 %v178_v26, %v177_v22  ;;  %v184_v38 = vshrl.u32 %v613_v50, %v175_v7 }
  0x9a   :  { %v182_v36 = vor.u32 %v181_v29, %v180_v27  ;;  %vm192_vm6 = vcmp.lt.s32.totalorder %v173_v6, 1  ;;  %vm194_vm7 = vcmp.lt.s32.totalorder %v173_v6, 3  ;;  %vm193_vm8 = vcmp.lt.s32.totalorder %v173_v6, 2 }
  0x9b   :  { %v201_v39 = vsel %vm195_vm5, %v188_v32, 920167782  ;;  %v205_v40 = vsel %vm195_vm5, %v191_v33, 1326507024  ;;  %v185_v43 = vor.u32 %v184_v38, %v183_v37  ;;  %v196_v47 = vsel %vm192_vm6, %v176_v34, %v179_v35 }
  0x9c   :  { %v200_v44 = vsel %vm192_vm6, %v179_v35, %v182_v36  ;;  %v206_v46 = vsel %vm194_vm7, %v188_v32, %v205_v40  ;;  %v73_v51 = vshll.u32 %v616_v21, %v695_v41  ;;  %v74_v53 = vshrl.u32 %v617_v23, %v700_v45 }
  0x9d   :  { %v197_v55 = vsel %vm195_vm5, %v185_v43, 2102212464  ;;  %v202_v57 = vsel %vm194_vm7, %v185_v43, %v201_v39  ;;  %v204_v60 = vsel %vm192_vm6, %v182_v36, %v185_v43  ;;  %v77_v61 = vshrl.u32 %v618_v28, %v700_v45 }
  0x9e   :  { %v198_v7 = vsel %vm194_vm7, %v182_v36, %v197_v55  ;;  %v203_v15 = vsel %vm193_vm8, %v200_v44, %v202_v57  ;;  %v207_v18 = vsel %vm193_vm8, %v204_v60, %v206_v46  ;;  %v75_v19 = vor.u32 %v74_v53, %v73_v51 }
  0x9f   :  { %v199_v20 = vsel %vm193_vm8, %v196_v47, %v198_v7  ;;  %v776_v22 = vmul.u32.u64.low %v724_v63, %v207_v18  ;;  %v777_v26 = vmul.u32.u64.high %v724_v63, %v207_v18, %v776_v22  ;;  %v78_v27 = vor.u32 %v77_v61, %v76_v54 }
  0xa0   :  { %v101_v29 = vsel %vm91_vm4, %v87_v4, 1326507024  ;;  %vm403_vm9 = vcmp.lt.s32.totalorder %v732_v2, 4  ;;  %v783_v6 = vmul.u32.u64.low %v724_v63, %v203_v15  ;;  %v784_v32 = vmul.u32.u64.high %v724_v63, %v203_v15, %v783_v6 }
  0xa1   :  { %v396_v33 = vor.u32 %v395_v9, %v394_v5  ;;  %v399_v34 = vor.u32 %v751_v14, %v747_v13  ;;  %v79_v35 = vshll.u32 %v618_v28, %v695_v41  ;;  %v80_v36 = vshrl.u32 %v613_v50, %v700_v45 }
  0xa2   :  { %v215_v37 = vmul.u32 %v724_v63, %v199_v20  ;;  %v72_v4 = vshrl.u32 %v616_v21, %v700_v45  ;;  %vm88_vm10 = vcmp.lt.s32.totalorder %v705_v49, 1  ;;  %vm90_vm11 = vcmp.lt.s32.totalorder %v705_v49, 3 }
  0xa3   :  { %vm217_vm12 = vc.u32 %v777_v26, %v783_v6  ;;  %v81_v5 = vor.u32 %v80_v36, %v79_v35  ;;  %v96_v9 = vsel %vm88_vm10, %v75_v19, %v78_v27  ;;  %v102_v41 = vsel %vm90_vm11, %v717_v59, %v101_v29 }
  0xa4   :  { %v218_v13 = vadd.s32 1, %v784_v32  ;;  %vm89_vm13 = vcmp.lt.s32.totalorder %v705_v49, 2  ;;  %v92_v63 = vsel %vm88_vm10, %v72_v4, %v75_v19  ;;  %v375_v45 = vand.u32 8388607, %v368_v3 }
  0xa5   :  { %v93_v14 = vsel %vm91_vm4, %v81_v5, 2102212464  ;;  %v98_v38 = vsel %vm90_vm11, %v81_v5, %v741_v8  ;;  %v100_v39 = vsel %vm88_vm10, %v78_v27, %v81_v5  ;;  %v386_v40 = vshrl.u32 %v617_v23, %v722_v62 }
  0xa6   :  { %v219_v59 = vsel %vm217_vm12, %v218_v13, %v784_v32  ;;  %v99_v43 = vsel %vm89_vm13, %v96_v9, %v98_v38  ;;  %v103_v44 = vsel %vm89_vm13, %v100_v39, %v102_v41  ;;  %v385_v46 = vshll.u32 %v616_v21, %v715_v58 }
  0xa7   :  { %v220_v47 = vadd.s32 %v219_v59, %v215_v37  ;;  %v94_v51 = vsel %vm90_vm11, %v78_v27, %v93_v14  ;;  %v824_v8 = vmul.u32.u64.low %v726_v0, %v103_v44  ;;  %v825_v53 = vmul.u32.u64.high %v726_v0, %v103_v44, %v824_v8 }
  0xa8   :  { %v291_v54 = vshrl.u32 %v614_v52, %v729_v1  ;;  %v409_v55 = vsel %vm403_vm9, %v396_v33, 920167782  ;;  %v832_v57 = vmul.u32.u64.low %v726_v0, %v99_v43  ;;  %v833_v60 = vmul.u32.u64.high %v726_v0, %v99_v43, %v832_v57 }
  0xa9   :  { %v221_v61 = vadd.s32 536870912, %v220_v47  ;;  %v387_v7 = vor.u32 %v386_v40, %v385_v46  ;;  %v388_v15 = vshll.u32 %v617_v23, %v715_v58  ;;  %v389_v18 = vshrl.u32 %v618_v28, %v722_v62 }
  0xaa   :  { %v413_v19 = vsel %vm403_vm9, %v399_v34, 1326507024  ;;  %v95_v20 = vsel %vm89_vm13, %v92_v63, %v94_v51  ;;  %v391_v22 = vshll.u32 %v618_v28, %v715_v58  ;;  %v392_v27 = vshrl.u32 %v613_v50, %v722_v62 }
  0xab   :  { %v848_v29 = vshrl.u32 %v221_v61, 30  ;;  %vm113_vm14 = vc.u32 %v825_v53, %v832_v57  ;;  %v376_v32 = vor.u32 8388608, %v375_v45  ;;  %v390_v35 = vor.u32 %v389_v18, %v388_v15 }
  0xac   :  { %v114_v36 = vadd.s32 1, %v833_v60  ;;  %v393_v37 = vor.u32 %v392_v27, %v391_v22  ;;  %vm400_vm15 = vcmp.lt.s32.totalorder %v732_v2, 1  ;;  %vm402_vm0 = vcmp.lt.s32.totalorder %v732_v2, 3 }
  0xad   :  { %v223_v49 = vshll.u32 %v848_v29, 30  ;;  %v111_v58 = vmul.u32 %v726_v0, %v95_v20  ;;  %v408_v34 = vsel %vm400_vm15, %v387_v7, %v390_v35  ;;  %v414_v4 = vsel %vm402_vm0, %v396_v33, %v413_v19 }
  0xae   :  { %v115_v5 = vsel %vm113_vm14, %v114_v36, %v833_v60  ;;  %v405_v9 = vsel %vm403_vm9, %v393_v37, 2102212464  ;;  %v410_v41 = vsel %vm402_vm0, %v393_v37, %v409_v55  ;;  %v412_v13 = vsel %vm400_vm15, %v390_v35, %v393_v37 }
  0xaf   :  { %v224_v63 = vsub.s32 %v220_v47, %v223_v49  ;;  %v116_v45 = vadd.s32 %v115_v5, %v111_v58  ;;  %v384_v0 = vshrl.u32 %v616_v21, %v722_v62  ;;  %vm401_vm1 = vcmp.lt.s32.totalorder %v732_v2, 2 }
  0xb0   :  { %v294_v33 = vshrl.u32 %v615_v56, %v729_v1  ;;  %v411_v14 = vsel %vm401_vm1, %v408_v34, %v410_v41  ;;  %v415_v38 = vsel %vm401_vm1, %v412_v13, %v414_v4  ;;  %v416_v39 = vshll.u32 %v376_v32, 8 }
  0xb1   :  { %v226_v40 = vsub.s32 0, %v224_v63  ;;  %v117_v59 = vadd.s32 536870912, %v116_v45  ;;  %v404_v43 = vsel %vm400_vm15, %v384_v0, %v387_v7  ;;  %v406_v62 = vsel %vm402_vm0, %v390_v35, %v405_v9 }
  0xb2   :  { %v881_v44 = vmul.u32.u64.low %v416_v39, %v415_v38  ;;  %v882_v46 = vmul.u32.u64.high %v416_v39, %v415_v38, %v881_v44  ;;  %v884_v47 = vmul.u32.u64.low %v416_v39, %v411_v14  ;;  %v885_v56 = vmul.u32.u64.high %v416_v39, %v411_v14, %v884_v47 }
  0xb3   :  { %v290_v51 = vshll.u32 %v613_v50, %v703_v48  ;;  %v531_v8 = vmin.u32 %v226_v40, %v224_v63  ;;  %v890_v55 = vshrl.u32 %v117_v59, 30  ;;  %v893_v60 = vshrl.u32 %v697_v42, 5 }
  0xb4   :  { %v293_v61 = vshll.u32 %v614_v52, %v703_v48  ;;  %v407_v18 = vsel %vm401_vm1, %v404_v43, %v406_v62  ;;  %vm425_vm2 = vc.u32 %v882_v46, %v884_v47  ;;  %v246_v27 = vsub.s32 4, %v848_v29 }
  0xb5   :  { %v897_v7 = vor.u32 %v291_v54, %v290_v51  ;;  %v228_v15 = vclz %v531_v8  ;;  %v119_v20 = vshll.u32 %v890_v55, 30  ;;  %v426_v42 = vadd.s32 1, %v885_v56 }
  0xb6   :  { %v295_v19 = vor.u32 %v294_v33, %v293_v61  ;;  %v264_v32 = vand.u32 2147483647, %v677_v16  ;;  %vm299_vm3 = vcmp.lt.s32.totalorder %v893_v60, 4  ;;  %vm162_vm4 = vcmp.lt.s32.totalorder %v685_v25, 0 }
  0xb7   :  { %v532_v22 = vadd.s32 4294967294, %v228_v15  ;;  %v909_v52 = vsub.s32 %v116_v45, %v119_v20  ;;  %v423_v2 = vmul.u32 %v416_v39, %v407_v18  ;;  %v305_v54 = vsel %vm299_vm3, %v897_v7, 920167782 }
  0xb8   :  { %vm916_vm5 = vcmp.le.f32.partialorder %v160_v30, 0.7853982  ;;  %v427_v36 = vsel %vm425_vm2, %v426_v42, %v885_v56  ;;  %v309_v37 = vsel %vm299_vm3, %v295_v19, 1326507024  ;;  %v216_v4 = vadd.s32 %v783_v6, %v777_v26 }
  0xb9   :  { %vm533_vm6 = vcmp.lt.s32.totalorder %v532_v22, 0  ;;  %v122_v58 = vsub.s32 0, %v909_v52  ;;  %v428_v34 = vadd.s32 %v427_v36, %v423_v2  ;;  %v929_v30 = vsel %vm162_vm4, %v246_v27, %v848_v29 }
  0xba   :  { %v231_v49 = vsel %vm533_vm6, 0, %v532_v22  ;;  %v282_v45 = vshrl.u32 %v617_v23, %v729_v1  ;;  %v285_v0 = vshrl.u32 %v618_v28, %v729_v1  ;;  %v288_v26 = vshrl.u32 %v613_v50, %v729_v1 }
  0xbb   :  { %v232_v5 = vsub.s32 32, %v231_v49  ;;  %v236_v9 = vsub.s32 4294967266, %v231_v49  ;;  %v527_v41 = vmin.u32 %v122_v58, %v909_v52  ;;  %v429_v13 = vadd.s32 536870912, %v428_v34 }
  0xbc   :  { %v233_v33 = vshll.u32 %v224_v63, %v231_v49  ;;  %v271_v29 = vand.u32 8388607, %v264_v32  ;;  %v281_v39 = vshll.u32 %v616_v21, %v703_v48  ;;  %v284_v40 = vshll.u32 %v617_v23, %v703_v48 }
  0xbd   :  { %v234_v14 = vshrl.u32 %v216_v4, %v232_v5  ;;  %v237_v38 = vadd.s32 127, %v236_v9  ;;  %v124_v6 = vclz %v527_v41  ;;  %v944_v62 = vshrl.u32 %v429_v13, 30 }
  0xbe   :  { %v287_v63 = vshll.u32 %v618_v28, %v703_v48  ;;  %v112_v50 = vadd.s32 %v832_v57, %v825_v53  ;;  %v283_v56 = vor.u32 %v282_v45, %v281_v39  ;;  %v286_v51 = vor.u32 %v285_v0, %v284_v40 }
  0xbf   :  { %v235_v59 = vor.u32 %v234_v14, %v233_v33  ;;  %v238_v43 = vshll.u32 %v237_v38, 23  ;;  %v528_v44 = vadd.s32 4294967294, %v124_v6  ;;  %v249_v61 = vsel %vm916_vm5, 0, %v929_v30 }
  0xc0   :  { %v431_v23 = vshll.u32 %v944_v62, 30  ;;  %v289_v15 = vor.u32 %v288_v26, %v287_v63  ;;  %v272_v18 = vor.u32 8388608, %v271_v29  ;;  %v280_v19 = vshrl.u32 %v616_v21, %v729_v1 }
  0xc1   :  { %v239_v8 = vor.u32 4788187, %v238_v43  ;;  %vm529_vm7 = vcmp.lt.s32.totalorder %v528_v44, 0  ;;  %vm296_vm8 = vcmp.lt.s32.totalorder %v893_v60, 1  ;;  %v242_v28 = vcvt.s32.f32 %v235_v59 }
  0xc2   :  { %v127_v53 = vsel %vm529_vm7, 0, %v528_v44  ;;  %v432_v57 = vsub.s32 %v428_v34, %v431_v23  ;;  %vm298_vm9 = vcmp.lt.s32.totalorder %v893_v60, 3  ;;  %v304_v27 = vsel %vm296_vm8, %v283_v56, %v286_v51 }
  0xc3   :  { %v240_v48 = vand.u32 2147483647, %v239_v8  ;;  %v128_v20 = vsub.s32 32, %v127_v53  ;;  %v132_v22 = vsub.s32 4294967266, %v127_v53  ;;  %v306_v36 = vsel %vm298_vm9, %v289_v15, %v305_v54 }
  0xc4   :  { %v434_v2 = vsub.s32 0, %v432_v57  ;;  %v308_v1 = vsel %vm296_vm8, %v286_v51, %v289_v15  ;;  %v129_v21 = vshll.u32 %v909_v52, %v127_v53  ;;  %v310_v34 = vsel %vm298_vm9, %v897_v7, %v309_v37 }
  0xc5   :  { %v243_v42 = vmul.f32 %v242_v28, %v240_v48  ;;  %v130_v49 = vshrl.u32 %v112_v50, %v128_v20  ;;  %v133_v58 = vadd.s32 127, %v132_v22  ;;  %vm297_vm10 = vcmp.lt.s32.totalorder %v893_v60, 2 }
  0xc6   :  { %v539_v5 = vmin.u32 %v434_v2, %v432_v57  ;;  %v301_v9 = vsel %vm299_vm3, %v289_v15, 2102212464  ;;  %v300_v41 = vsel %vm296_vm8, %v280_v19, %v283_v56  ;;  %v311_v52 = vsel %vm297_vm10, %v308_v1, %v310_v34 }
  0xc7   :  { %v244_v4 = vxor.u32 2147483648, %v243_v42  ;;  %v131_v30 = vor.u32 %v130_v49, %v129_v21  ;;  %v134_v54 = vshll.u32 %v133_v58, 23  ;;  %v307_v7 = vsel %vm297_vm10, %v304_v27, %v306_v36 }
  0xc8   :  { %v436_v45 = vclz %v539_v5  ;;  %v312_v37 = vshll.u32 %v272_v18, 8  ;;  %v302_v38 = vsel %vm298_vm9, %v286_v51, %v301_v9  ;;  %v253_v35 = vadd.s32 3, %v249_v61 }
  0xc9   :  { %v245_v13 = vsel %vm162_vm4, %v244_v4, %v243_v42  ;;  %v135_v33 = vor.u32 4788187, %v134_v54  ;;  %v138_v14 = vcvt.s32.f32 %v131_v30  ;;  %v142_v63 = vsub.s32 4, %v890_v55 }
  0xca   :  { %v248_v0 = vsel %vm916_vm5, %v685_v25, %v245_v13  ;;  %v540_v26 = vadd.s32 4294967294, %v436_v45  ;;  %v984_v6 = vmul.u32.u64.low %v312_v37, %v311_v52  ;;  %v985_v29 = vmul.u32.u64.high %v312_v37, %v311_v52, %v984_v6  ;;  %v480_v13 = vpop.permute.xlu1 %479 }
  0xcb   :  { %570 = vcosq.f32 %v248_v0  ;;  %v136_v39 = vand.u32 2147483647, %v135_v33  ;;  %v987_v40 = vmul.u32.u64.low %v312_v37, %v307_v7  ;;  %v988_v59 = vmul.u32.u64.high %v312_v37, %v307_v7, %v987_v40 }
  0xcc   :  { %572 = vsinq.f32 %v248_v0  ;;  %vm541_vm11 = vcmp.lt.s32.totalorder %v540_v26, 0  ;;  %v303_v44 = vsel %vm297_vm10, %v300_v41, %v302_v38  ;;  %vm58_vm12 = vcmp.lt.s32.totalorder %v679_v17, 0 }
  0xcd   :  { %574 = vrcp.f32 %v672_v12  ;;  %v139_v43 = vmul.f32 %v138_v14, %v136_v39  ;;  %v439_v50 = vsel %vm541_vm11, 0, %v540_v26  ;;  %v424_v56 = vadd.s32 %v884_v47, %v882_v46  ;;  %v475_v12 = vpop.permute.xlu0 %474 }
  0xce   :  { %v440_v51 = vsub.s32 32, %v439_v50  ;;  %v444_v8 = vsub.s32 4294967266, %v439_v50  ;;  %vm1000_vm13 = vcmp.le.f32.partialorder %v56_v31, 0.7853982  ;;  %vm321_vm14 = vc.u32 %v985_v29, %v987_v40 }
  0xcf   :  { %v140_v61 = vxor.u32 2147483648, %v139_v43  ;;  %v322_v60 = vadd.s32 1, %v988_v59  ;;  %v441_v23 = vshll.u32 %v432_v57, %v439_v50  ;;  %v319_v19 = vmul.u32 %v312_v37, %v303_v44 }
  0xd0   :  { %v442_v15 = vshrl.u32 %v424_v56, %v440_v51  ;;  %v445_v18 = vadd.s32 127, %v444_v8  ;;  %v254_v48 = vand.u32 3, %v253_v35  ;;  %v143_v47 = vsel %vm58_vm12, %v142_v63, %v890_v55 }
  0xd1   :  { %v141_v46 = vsel %vm58_vm12, %v140_v61, %v139_v43  ;;  %v323_v28 = vsel %vm321_vm14, %v322_v60, %v988_v59  ;;  %v145_v57 = vsel %vm1000_vm13, 0, %v143_v47  ;;  %v454_v9 = vsub.s32 4, %v944_v62 }
  0xd2   :  { %v144_v31 = vsel %vm1000_vm13, %v679_v17, %v141_v46  ;;  %v443_v53 = vor.u32 %v442_v15, %v441_v23  ;;  %v446_v20 = vshll.u32 %v445_v18, 23  ;;  %v324_v22 = vadd.s32 %v323_v28, %v319_v19 }
  0xd3   :  { %576 = vcosq.f32 %v144_v31  ;;  %vm259_vm15 = vcmp.eq.s32.totalorder %v254_v48, 2  ;;  %vm256_vm0 = vcmp.eq.s32.totalorder %v254_v48, 0  ;;  %v149_v5 = vadd.s32 3, %v145_v57 }
  0xd4   :  { %578 = vsinq.f32 %v144_v31  ;;  %v447_v42 = vor.u32 4788187, %v446_v20  ;;  %v325_v2 = vadd.s32 536870912, %v324_v22  ;;  %v450_v58 = vcvt.s32.f32 %v443_v53 }
  0xd5   :  { %v571_v27 = vpop.eup %570  ;;  %vm255_vm1 = vcmp.lt.s32.totalorder %v254_v48, 2  ;;  %vm252_vm2 = vweird.f32 %v685_v25  ;;  %vm370_vm3 = vcmp.lt.s32.totalorder %v683_v24, 0  ;;  %v150_v14 = vand.u32 3, %v149_v5 }
  0xd6   :  { %v573_v36 = vpop.eup %572  ;;  %v260_v55 = vxor.u32 2147483648, %v571_v27  ;;  %v448_v49 = vand.u32 2147483647, %v447_v42  ;;  %v1014_v34 = vshrl.u32 %v325_v2, 30  ;;  %v455_v38 = vsel %vm370_vm3, %v454_v9, %v944_v62 }
  0xd7   :  { %v575_v1 = vpop.eup %574  ;;  %v257_v21 = vxor.u32 2147483648, %v573_v36  ;;  %vm1027_vm4 = vcmp.le.f32.partialorder %v368_v3, 0.7853982  ;;  %vm155_vm5 = vcmp.eq.s32.totalorder %v150_v14, 2  ;;  %vm152_vm6 = vcmp.eq.s32.totalorder %v150_v14, 0 }
  0xd8   :  { %v261_v4 = vsel %vm259_vm15, %v260_v55, %v573_v36  ;;  %v451_v54 = vmul.f32 %v450_v58, %v448_v49  ;;  %v327_v41 = vshll.u32 %v1014_v34, 30  ;;  %v1022_v33 = vrot.slane %v575_v1, %v49_v11 }
  0xd9   :  { %v258_v30 = vsel %vm256_vm0, %v571_v27, %v257_v21  ;;  %v457_v62 = vsel %vm1027_vm4, 0, %v455_v38  ;;  %vm151_vm7 = vcmp.lt.s32.totalorder %v150_v14, 2  ;;  %vm148_vm8 = vweird.f32 %v679_v17 }
  0xda   :  { %v262_v52 = vsel %vm255_vm1, %v258_v30, %v261_v4  ;;  %v452_v7 = vxor.u32 2147483648, %v451_v54  ;;  %v328_v37 = vsub.s32 %v324_v22, %v327_v41  ;;  %v461_v56 = vadd.s32 3, %v457_v62 }
  0xdb   :  { %v263_v45 = vsel %vm252_vm2, nan, %v262_v52  ;;  %v320_v19 = vadd.s32 %v987_v40, %v985_v29  ;;  %vm460_vm13 = vweird.f32 %v683_v24  ;;  %v490_v40 = vpop.permute.xlu1 %489  ;;  %v350_v4 = vsub.s32 4, %v1014_v34 }
  0xdc   :  { %v493_v0 = vmul.f32 %v480_v13, %v263_v45  ;;  %v453_v25 = vsel %vm370_vm3, %v452_v7, %v451_v54  ;;  %v330_v6 = vsub.s32 0, %v328_v37  ;;  %v462_v23 = vand.u32 3, %v461_v56 }
  0xdd   :  { %v577_v39 = vpop.eup %576  ;;  %v456_v10 = vsel %vm1027_vm4, %v683_v24, %v453_v25  ;;  %vm266_vm14 = vcmp.lt.s32.totalorder %v677_v16, 0  ;;  %vm265_vm15 = vcmp.le.f32.partialorder %v264_v32, 0.7853982  ;;  %vm356_vm3 = vweird.f32 %v677_v16 }
  0xde   :  { %v503_v59 = vmul.f32 %v1022_v33, %v493_v0  ;;  %v579_v11 = vpop.eup %578  ;;  %v156_v35 = vxor.u32 2147483648, %v577_v39  ;;  %580 = vcosq.f32 %v456_v10  ;;  %v535_v43 = vmin.u32 %v330_v6, %v328_v37 }
  0xdf   :  { %v153_v3 = vxor.u32 2147483648, %v579_v11  ;;  %582 = vsinq.f32 %v456_v10  ;;  %vm467_vm10 = vcmp.eq.s32.totalorder %v462_v23, 2  ;;  %vm464_vm11 = vcmp.eq.s32.totalorder %v462_v23, 0 }
  0xe0   :  { %507 = vst [vmem:[#allocation2 + $0x8] sm:$0xff] %v503_v59  ;;  %v157_v63 = vsel %vm155_vm5, %v156_v35, %v579_v11  ;;  %v332_v50 = vclz %v535_v43  ;;  %vm463_vm12 = vcmp.lt.s32.totalorder %v462_v23, 2  ;;  %v351_v24 = vsel %vm266_vm14, %v350_v4, %v1014_v34  ;;  %v485_v34 = vpop.permute.xlu0 %484 }
  0xe1   :  { %v154_v44 = vsel %vm152_vm6, %v577_v39, %v153_v3  ;;  %v353_v41 = vsel %vm265_vm15, 0, %v351_v24 }
  0xe2   :  { %v158_v51 = vsel %vm151_vm7, %v154_v44, %v157_v63  ;;  %v536_v8 = vadd.s32 4294967294, %v332_v50  ;;  %v357_v52 = vadd.s32 3, %v353_v41 }
  0xe3   :  { %v159_v61 = vsel %vm148_vm8, nan, %v158_v51 }
  0xe4   :  { %v492_v60 = vmul.f32 %v475_v12, %v159_v61  ;;  %vm537_vm9 = vcmp.lt.s32.totalorder %v536_v8, 0  ;;  %v358_v13 = vand.u32 3, %v357_v52 }
  0xe5   :  { %v335_v15 = vsel %vm537_vm9, 0, %v536_v8 }
  0xe6   :  { %v502_v18 = vmul.f32 %v1022_v33, %v492_v60  ;;  %v336_v48 = vsub.s32 32, %v335_v15  ;;  %v340_v46 = vsub.s32 4294967266, %v335_v15  ;;  %v337_v28 = vshll.u32 %v328_v37, %v335_v15 }
  0xe7   :  { %vm363_vm0 = vcmp.eq.s32.totalorder %v358_v13, 2  ;;  %vm360_vm1 = vcmp.eq.s32.totalorder %v358_v13, 0  ;;  %vm359_vm2 = vcmp.lt.s32.totalorder %v358_v13, 2 }
  0xe8   :  { %v581_v47 = vpop.eup %580  ;;  %506 = vst [vmem:[#allocation2] sm:$0xff] %v502_v18  ;;  %v338_v31 = vshrl.u32 %v320_v19, %v336_v48  ;;  %v341_v17 = vadd.s32 127, %v340_v46 }
  0xe9   :  { %v583_v53 = vpop.eup %582  ;;  %v468_v20 = vxor.u32 2147483648, %v581_v47 }
  0xea   :  { %v465_v22 = vxor.u32 2147483648, %v583_v53  ;;  %v339_v27 = vor.u32 %v338_v31, %v337_v28  ;;  %v342_v57 = vshll.u32 %v341_v17, 23 }
  0xeb   :  { %v469_v42 = vsel %vm467_vm10, %v468_v20, %v583_v53 }
  0xec   :  { %v466_v2 = vsel %vm464_vm11, %v581_v47, %v465_v22  ;;  %v343_v36 = vor.u32 4788187, %v342_v57  ;;  %v346_v21 = vcvt.s32.f32 %v339_v27 }
  0xed   :  { %v470_v29 = vsel %vm463_vm12, %v466_v2, %v469_v42 }
  0xee   :  { %v471_v55 = vsel %vm460_vm13, nan, %v470_v29  ;;  %v344_v1 = vand.u32 2147483647, %v343_v36 }
  0xef   :  { %v495_v49 = vmul.f32 %v490_v40, %v471_v55 }
  0xf0   :  { %v347_v58 = vmul.f32 %v346_v21, %v344_v1 }
  0xf1   :  { %v505_v5 = vmul.f32 %v1022_v33, %v495_v49 }
  0xf2   :  { %v348_v9 = vxor.u32 2147483648, %v347_v58 }
  0xf3   :  { %509 = vst [vmem:[#allocation2 + $0x18] sm:$0xff] %v505_v5 }
  0xf4   :  { %v349_v30 = vsel %vm266_vm14, %v348_v9, %v347_v58 }
  0xf5   :  { %v352_v54 = vsel %vm265_vm15, %v677_v16, %v349_v30 }
  0xf6   :  { %584 = vcosq.f32 %v352_v54 }
  0xf7   :  { %586 = vsinq.f32 %v352_v54 }
 0x100   :  { %v585_v45 = vpop.eup %584 }
 0x101   :  { %v587_v7 = vpop.eup %586  ;;  %v364_v37 = vxor.u32 2147483648, %v585_v45 }
 0x102   :  { %v361_v0 = vxor.u32 2147483648, %v587_v7 }
 0x103   :  { %v365_v14 = vsel %vm363_vm0, %v364_v37, %v587_v7 }
 0x104   :  { %v362_v38 = vsel %vm360_vm1, %v585_v45, %v361_v0 }
 0x105   :  { %v366_v32 = vsel %vm359_vm2, %v362_v38, %v365_v14 }
 0x106   :  { %v367_v26 = vsel %vm356_vm3, nan, %v366_v32 }
 0x107   :  { %v494_v25 = vmul.f32 %v485_v34, %v367_v26 }
 0x109   :  { %v504_v6 = vmul.f32 %v1022_v33, %v494_v25 }
 0x10b   :  { %508 = vst [vmem:[#allocation2 + $0x10] sm:$0xff] %v504_v6 }
 0x10c   :  { %599 = shalt.err (!%p596_p4)
}
 0x10d   :  { %s600_s5 = scalar_lea.hbm %s1066_s3, 512 }
 0x10e   :  { %p601_p5 = scmp.ne.s32.totalorder %s1066_s3, %s600_s5  ;;  %p604_p6 = scmp.lt.u32.totalorder %s600_s5, %s1066_s3 }
 0x110   :  { %p606_p7 = pnand %p604_p6, %p601_p5 }
 0x112   :  { %609 = shalt.err (!%p606_p7)
}
 0x113   :  { %s620_s10 = smov 128   ;;  %s621_s11 = smov 8  }
 0x114   :  { %521 = dma.vmem_to_hbm [thread:$0]  %s516_s2, 512, %s1066_s3, [#allocation3], %s620_s10, %s620_s10, %s621_s11  }
 0x115   :  { %610 = dma.done.wait [#allocation3], 512  }
 0x116   :  { %611 = vsyncadd [#allocation3], 4294966784 }
 0x117   :  { %525 = vsyncpa [#allocation3], 1 }

</bundles_post_ra>
